<compile_context>
chip_gen: v5e
topology: v5e:2x2
jax: 0.10.0
libtpu: 0.0.40
codegen_flags: <defaults>
</compile_context>

<pallas_src>
import functools

import jax
import jax.numpy as jnp
from jax.experimental import pallas as pl
from jax.experimental.pallas import tpu as pltpu


def _round_up(n, m):
    return ((n + m - 1) // m) * m


def _qnet_kernel(x_ref, w1_ref, b1_ref, w2_ref, b2_ref, o_ref):
    # Two MXU matmuls with f32 accumulation + f32 VPU bias/ReLU epilogue.
    x = x_ref[...]
    h = jnp.dot(x, w1_ref[...], preferred_element_type=jnp.float32) + b1_ref[...]
    h = jnp.maximum(h, 0.0)                  # ReLU in f32 (VPU; v5e-safe)
    h = h.astype(w2_ref.dtype)               # feed MXU in compute dtype
    y = jnp.dot(h, w2_ref[...], preferred_element_type=jnp.float32) + b2_ref[...]
    o_ref[...] = y.astype(o_ref.dtype)


def prepare_params(w1, b1, w2, b2, compute_dtype=jnp.bfloat16):
    """One-time param preparation (hoisted out of the per-call forward).

    Weights -> compute_dtype (bf16 by default), biases stay f32.
    """
    return (w1.astype(compute_dtype), b1.astype(jnp.float32),
            w2.astype(compute_dtype), b2.astype(jnp.float32))


@functools.partial(jax.jit, static_argnames=("block_batch", "compute_dtype"))
def linear_qnet_forward(x, w1, b1, w2, b2, *, block_batch=2048,
                        compute_dtype=jnp.bfloat16):
    """Forward pass of Linear_QNet.

    x:  (B, input_size)
    w1: (input_size, hidden)   (transpose of PyTorch's (out, in) layout)
    b1: (1, hidden)
    w2: (hidden, output)
    b2: (1, output)
    Returns (B, output) float32.
    """
    B, in_size = x.shape
    hid = w1.shape[1]
    out_size = w2.shape[1]

    cd_bytes = jnp.dtype(compute_dtype).itemsize
    # dtype-aware sublane rounding: bf16 packs 2 rows / sublane, int8 packs 4.
    sub = 8 if cd_bytes == 4 else (16 if cd_bytes == 2 else 32)

    # ---- batch tile selection ----------------------------------------------
    if B <= 2 * sub:
        # Tiny / latency path (B ~ 1): one grid step.
        tb = _round_up(B, sub)
    elif B <= block_batch:
        # Mid-sized B: force >= 2 grid steps so the "parallel" axis can shard
        # across both TensorCores on v7x.
        tb = _round_up(-(-B // 2), sub)
    else:
        tb = _round_up(block_batch, sub)

    # Conservative VMEM cap: double-buffered x + out blocks + resident weights
    # must fit the smallest default scoped VMEM (16 MiB on v5e), which also
    # keeps us well inside v7x's 64 MiB physical VMEM.
    VMEM_BUDGET = 16 * 1024 * 1024
    weight_bytes = (in_size * hid + hid * out_size) * cd_bytes + (hid + out_size) * 4
    per_row = 2 * (in_size * cd_bytes + out_size * 4)   # x (cd) + out (f32), 2-deep
    max_tb = max(sub, (((VMEM_BUDGET - weight_bytes) // per_row) // sub) * sub)
    tb = min(tb, max_tb)

    # Ragged grid: no wrapper-side zero-pad copy of x. Pallas masks the
    # partial last block; garbage rows only affect masked-out output rows.
    grid = (pl.cdiv(B, tb),)

    # No-ops if params were prepared with prepare_params().
    xp = x.astype(compute_dtype)
    w1c = w1.astype(compute_dtype)
    w2c = w2.astype(compute_dtype)
    b1c = b1.astype(jnp.float32)
    b2c = b2.astype(jnp.float32)

    out = pl.pallas_call(
        _qnet_kernel,
        out_shape=jax.ShapeDtypeStruct((B, out_size), jnp.float32),
        grid_spec=pltpu.PrefetchScalarGridSpec(
            num_scalar_prefetch=0,
            grid=grid,
            in_specs=[
                # x: tiled along batch only (ragged last block is masked).
                pl.BlockSpec((tb, in_size), lambda i: (i, 0)),
                # Weights / biases: constant index_map -> DMA'd once, stay
                # VMEM-resident across all grid steps.
                pl.BlockSpec((in_size, hid), lambda i: (0, 0)),
                pl.BlockSpec((1, hid), lambda i: (0, 0)),
                pl.BlockSpec((hid, out_size), lambda i: (0, 0)),
                pl.BlockSpec((1, out_size), lambda i: (0, 0)),
            ],
            # Full-dim (out_size-wide) output block: no 4->128 lane padding,
            # no 32x write amplification, no wrapper-side column slice.
            out_specs=pl.BlockSpec((tb, out_size), lambda i: (i, 0)),
        ),
        compiler_params=pltpu.CompilerParams(
            # Batch axis is independent -> shard across both TCs on v7x.
            dimension_semantics=("parallel",),
        ),
    )(xp, w1c, b1c, w2c, b2c)

    return out


def init_params(key, input_size, hidden_size, output_size):
    """Deterministic init mimicking nn.Linear's uniform(-1/sqrt(fan_in), +)."""
    k1, k2, k3, k4 = jax.random.split(key, 4)
    s1 = 1.0 / (input_size ** 0.5)
    s2 = 1.0 / (hidden_size ** 0.5)
    w1 = jax.random.uniform(k1, (input_size, hidden_size), jnp.float32, -s1, s1)
    b1 = jax.random.uniform(k2, (1, hidden_size), jnp.float32, -s1, s1)
    w2 = jax.random.uniform(k3, (hidden_size, output_size), jnp.float32, -s2, s2)
    b2 = jax.random.uniform(k4, (1, output_size), jnp.float32, -s2, s2)
    return w1, b1, w2, b2


def _reference(x, w1, b1, w2, b2):
    return jnp.maximum(x @ w1 + b1, 0.0) @ w2 + b2


if __name__ == "__main__":
    input_size, hidden_size, output_size = 16, 32, 4

    key = jax.random.PRNGKey(0)
    kx, kp, kb, k1 = jax.random.split(key, 4)
    w1, b1, w2, b2 = init_params(kp, input_size, hidden_size, output_size)

    # ---- f32 path, small batch (single grid step) ---------------------------
    x_small = jax.random.normal(kx, (8, input_size), jnp.float32)
    pf32 = prepare_params(w1, b1, w2, b2, compute_dtype=jnp.float32)
    y_small = linear_qnet_forward(x_small, *pf32, compute_dtype=jnp.float32)
    jax.block_until_ready(y_small)
    ref_small = _reference(x_small, w1, b1, w2, b2)
    assert y_small.shape == (8, output_size)
    assert jnp.allclose(y_small, ref_small, atol=1e-5, rtol=1e-5)

    # ---- f32 path, batched (ragged grid, multi-step, B > block_batch) -------
    x_big = jax.random.normal(kb, (300, input_size), jnp.float32)
    y_big = linear_qnet_forward(x_big, *pf32, block_batch=128,
                                compute_dtype=jnp.float32)
    jax.block_until_ready(y_big)
    ref_big = _reference(x_big, w1, b1, w2, b2)
    assert y_big.shape == (300, output_size)
    assert jnp.allclose(y_big, ref_big, atol=1e-4, rtol=1e-4)

    # ---- bf16 default path (hoisted param prep, >=2 grid steps for v7x) -----
    # bf16 inputs/weights with f32 accumulation: loose tolerance is expected
    # and acceptable for a Q-net.
    pbf16 = prepare_params(w1, b1, w2, b2, compute_dtype=jnp.bfloat16)
    y_bf16 = linear_qnet_forward(x_big, *pbf16)           # defaults: bf16, 2048
    jax.block_until_ready(y_bf16)
    assert y_bf16.shape == (300, output_size)
    assert jnp.allclose(y_bf16, ref_big, atol=5e-2, rtol=5e-2)

    # ---- bf16 latency path (B = 1, Q-net inference) --------------------------
    x_one = jax.random.normal(k1, (1, input_size), jnp.float32)
    y_one = linear_qnet_forward(x_one, *pbf16)
    jax.block_until_ready(y_one)
    ref_one = _reference(x_one, w1, b1, w2, b2)
    assert y_one.shape == (1, output_size)
    assert jnp.allclose(y_one, ref_one, atol=5e-2, rtol=5e-2)

    print("KERNEL_OK")
</pallas_src>

<mosaic_0001>
module attributes {stable_mosaic.version = 11 : i64} {
  func.func @_qnet_kernel(%arg0: i32, %arg1: memref<8x16xf32, #tpu.memory_space<vmem>>, %arg2: memref<16x32xf32, #tpu.memory_space<vmem>>, %arg3: memref<1x32xf32, #tpu.memory_space<vmem>>, %arg4: memref<32x4xf32, #tpu.memory_space<vmem>>, %arg5: memref<1x4xf32, #tpu.memory_space<vmem>>, %arg6: memref<8x4xf32, #tpu.memory_space<vmem>>) attributes {dimension_semantics = [#tpu.dimension_semantics<parallel>], iteration_bounds = array<i64: 1>, scalar_prefetch = 0 : i64, scratch_operands = 0 : i64, tpu.core_type = #tpu.core_type<tc>, window_params = [{transform_indices = @transform_0, window_bounds = array<i64: 8, 16>}, {pipeline_mode = #tpu.pipeline_mode<synchronous>, transform_indices = @transform_1, window_bounds = array<i64: 16, 32>}, {pipeline_mode = #tpu.pipeline_mode<synchronous>, transform_indices = @transform_2, window_bounds = array<i64: 1, 32>}, {pipeline_mode = #tpu.pipeline_mode<synchronous>, transform_indices = @transform_3, window_bounds = array<i64: 32, 4>}, {pipeline_mode = #tpu.pipeline_mode<synchronous>, transform_indices = @transform_4, window_bounds = array<i64: 1, 4>}, {transform_indices = @transform_5, window_bounds = array<i64: 8, 4>}]} {
    %c0 = arith.constant 0 : index
    %c0_0 = arith.constant 0 : index
    %0 = vector.load %arg1[%c0, %c0_0] : memref<8x16xf32, #tpu.memory_space<vmem>>, vector<8x16xf32>
    %c0_1 = arith.constant 0 : index
    %c0_2 = arith.constant 0 : index
    %1 = vector.load %arg2[%c0_1, %c0_2] : memref<16x32xf32, #tpu.memory_space<vmem>>, vector<16x32xf32>
    %cst = arith.constant dense<0.000000e+00> : vector<8x32xf32>
    %2 = tpu.matmul %0, %1, %cst {dimension_numbers = #tpu.dot_dimension_numbers<[1], [0], [0], [1], [0, 0, 1, 1], [], []>} : vector<8x16xf32>, vector<16x32xf32>, vector<8x32xf32> -> vector<8x32xf32>
    %c0_3 = arith.constant 0 : index
    %c0_4 = arith.constant 0 : index
    %3 = vector.load %arg3[%c0_3, %c0_4] : memref<1x32xf32, #tpu.memory_space<vmem>>, vector<1x32xf32>
    %4 = vector.broadcast %3 : vector<1x32xf32> to vector<8x32xf32>
    %5 = arith.addf %2, %4 : vector<8x32xf32>
    %cst_5 = arith.constant 0.000000e+00 : f32
    %6 = vector.broadcast %cst_5 : f32 to vector<8x32xf32>
    %7 = arith.maximumf %5, %6 : vector<8x32xf32>
    %c0_6 = arith.constant 0 : index
    %c0_7 = arith.constant 0 : index
    %8 = vector.load %arg4[%c0_6, %c0_7] : memref<32x4xf32, #tpu.memory_space<vmem>>, vector<32x4xf32>
    %cst_8 = arith.constant dense<0.000000e+00> : vector<8x4xf32>
    %9 = tpu.matmul %7, %8, %cst_8 {dimension_numbers = #tpu.dot_dimension_numbers<[1], [0], [0], [1], [0, 0, 1, 1], [], []>} : vector<8x32xf32>, vector<32x4xf32>, vector<8x4xf32> -> vector<8x4xf32>
    %c0_9 = arith.constant 0 : index
    %c0_10 = arith.constant 0 : index
    %10 = vector.load %arg5[%c0_9, %c0_10] : memref<1x4xf32, #tpu.memory_space<vmem>>, vector<1x4xf32>
    %11 = vector.broadcast %10 : vector<1x4xf32> to vector<8x4xf32>
    %12 = arith.addf %9, %11 : vector<8x4xf32>
    %c0_11 = arith.constant 0 : index
    %c0_12 = arith.constant 0 : index
    %13 = vector.load %arg6[%c0_11, %c0_12] : memref<8x4xf32, #tpu.memory_space<vmem>>, vector<8x4xf32>
    tpu.vector_store %arg6[%c0_11, %c0_12], %12 {strides = array<i32>} : memref<8x4xf32, #tpu.memory_space<vmem>>, vector<8x4xf32>,
    return
  }
  func.func @transform_0(%arg0: i32) -> (i32, i32) {
    %c0_i32 = arith.constant 0 : i32
    %c0_i32_0 = arith.constant 0 : i32
    return %arg0, %c0_i32 : i32, i32
  }
  func.func @transform_1(%arg0: i32) -> (i32, i32) {
    %c0_i32 = arith.constant 0 : i32
    %c0_i32_0 = arith.constant 0 : i32
    %c0_i32_1 = arith.constant 0 : i32
    return %c0_i32, %c0_i32_0 : i32, i32
  }
  func.func @transform_2(%arg0: i32) -> (i32, i32) {
    %c0_i32 = arith.constant 0 : i32
    %c0_i32_0 = arith.constant 0 : i32
    %c0_i32_1 = arith.constant 0 : i32
    return %c0_i32, %c0_i32_0 : i32, i32
  }
  func.func @transform_3(%arg0: i32) -> (i32, i32) {
    %c0_i32 = arith.constant 0 : i32
    %c0_i32_0 = arith.constant 0 : i32
    %c0_i32_1 = arith.constant 0 : i32
    return %c0_i32, %c0_i32_0 : i32, i32
  }
  func.func @transform_4(%arg0: i32) -> (i32, i32) {
    %c0_i32 = arith.constant 0 : i32
    %c0_i32_0 = arith.constant 0 : i32
    %c0_i32_1 = arith.constant 0 : i32
    return %c0_i32, %c0_i32_0 : i32, i32
  }
  func.func @transform_5(%arg0: i32) -> (i32, i32) {
    %c0_i32 = arith.constant 0 : i32
    %c0_i32_0 = arith.constant 0 : i32
    return %arg0, %c0_i32 : i32, i32
  }
}

</mosaic_0001>

<bundles_post_ra>
// kernel: linear_qnet_forward.1
= control target key start
LH: loop header
LB: loop body
LE: loop exit
PB: predicated region body
PF: predicated region fallthrough
CT: control target
= control target key end

     0   :  { %vm27_vm0 = vcmask 130048   ;;  %vm60_vm1 = vcmask 261120   ;;  %vm84_vm2 = vcmask 31744   ;;  %s154_s1 = inlined_call_operand.vmem [shape: f32[16,32], index: 1, kind: input, shape index: {}]   ;;  %s155_s0 = inlined_call_operand.vmem [shape: f32[8,16], index: 0, kind: input, shape index: {}]   ;;  %s156_s3 = inlined_call_operand.vmem [shape: f32[32,4], index: 3, kind: input, shape index: {}]   ;;  %s157_s2 = inlined_call_operand.vmem [shape: f32[1,32], index: 2, kind: input, shape index: {}]   ;;  %s158_s4 = inlined_call_operand.vmem [shape: f32[1,4], index: 4, kind: input, shape index: {}]   ;;  %s159_s5 = inlined_call_operand.vmem [shape: f32[8,4], index: 5, kind: output, shape index: {}]  }
   0x1   :  { %v22_v0 = vld [vmem:[%s154_s1 + $0x8] sm:$0xff]  ;;  %v21_v1 = vld [vmem:[%s154_s1] sm:$0xff]  ;;  %v55_v3 = vld [vmem:[%s156_s3 + $0x18] sm:$0xff] }
   0x2   :  { %45 = vmatpush.msra.mxu0 %v22_v0  ;;  %v20_v2 = vld [vmem:[%s155_s0] sm:$0xff]  ;;  %76 = vmatpush.msra.mxu1 %v55_v3  ;;  %v54_v4 = vld [vmem:[%s156_s3 + $0x10] sm:$0xff]  ;;  %v53_v5 = vld [vmem:[%s156_s3 + $0x8] sm:$0xff] }
   0x3   :  { %v52_v6 = vld [vmem:[%s156_s3] sm:$0xff] }
   0x4   :  { %46 = vmatpush.msra.mxu0 %v21_v1  ;;  %77 = vmatpush.msra.mxu1 %v54_v4  ;;  %v92_v7 = vld [vmem:[%s157_s2] ss:$0 sm:$0xff] }
   0x5   :  { %90 = vmatmul.msk.f32.vlgmr.msra.gmra.mxu0 %vm27_vm0, %v20_v2  ;;  %v93_v11 = vld [vmem:[%s158_s4] ss:$0 sm:$0xff] }
   0x6   :  { %78 = vmatpush.msra.mxu1 %v53_v5 }
   0x8   :  { %79 = vmatpush.msra.mxu1 %v52_v6 }
  0x82   :  { %v48_v8 = vpop.f32.mrf.mxu0 }
  0x83   :  { %v49_v9 = vadd.f32 %v92_v7, %v48_v8 }
  0x85   :  { %v51_v10 = vmax.f32 %v49_v9, 0.0 }
  0x87   :  { %91 = vmatmul.msk.f32.vlgmr.msra.gmra.mxu1 %vm60_vm1, %v51_v10 }
 0x104   :  { %v81_v12 = vpop.f32.mrf.mxu1 }
 0x105   :  { %v82_v13 = vadd.f32 %v93_v11, %v81_v12 }
 0x107   :  { %85 = vst.msk [vmem:[%s159_s5] sm:$0xff] %vm84_vm2, %v82_v13 }

</bundles_post_ra>
